<compile_context>
chip_gen: v6e
topology: v6e:2x2x1
jax: 0.10.0
libtpu: 0.0.40
codegen_flags: <defaults>
</compile_context>

<pallas_src>
import functools

import jax
import jax.numpy as jnp
from jax.experimental import pallas as pl
from jax.experimental.pallas import tpu as pltpu


def _round_up(n, m):
    return ((n + m - 1) // m) * m


def actor_kernel(x_ref, w1_ref, b1_ref, w2_ref, b2_ref, w3_ref, b3_ref, o_ref):
    # Feature dims stay at their natural (unpadded) widths; Mosaic pads
    # operands to vreg tiles internally at zero HBM cost.
    x = x_ref[...].astype(w1_ref.dtype)
    # Layer 1: (TB, In) @ (In, 128) + b1 -> ReLU   (f32 accumulate on MXU)
    h1 = jnp.dot(x, w1_ref[...], preferred_element_type=jnp.float32)
    h1 = jnp.maximum(h1 + b1_ref[...], 0.0)
    # Layer 2: (TB, 128) @ (128, 64) + b2 -> ReLU
    h2 = jnp.dot(h1.astype(w2_ref.dtype), w2_ref[...],
                 preferred_element_type=jnp.float32)
    h2 = jnp.maximum(h2 + b2_ref[...], 0.0)
    # Layer 3: (TB, 64) @ (64, Out) + b3   (no activation)
    out = jnp.dot(h2.astype(w3_ref.dtype), w3_ref[...],
                  preferred_element_type=jnp.float32)
    o_ref[...] = (out + b3_ref[...]).astype(o_ref.dtype)


def prepare_actor_params(params, *, use_bf16=True):
    """One-time params transform (do this OUTSIDE the per-step forward):
    cast weights for the MXU, keep biases f32 shaped (1, out_features)."""
    mm_dtype = jnp.bfloat16 if use_bf16 else jnp.float32
    prepared = {}
    for i in (1, 2, 3):
        prepared[f"w{i}"] = params[f"w{i}"].astype(mm_dtype)
        prepared[f"b{i}"] = params[f"b{i}"].reshape(1, -1).astype(jnp.float32)
    return prepared


def actor_forward(x, prepared, *, block_b=1024):
    """x: (B, input_size). prepared: output of prepare_actor_params
    (weights stored transposed to (in_features, out_features))."""
    w1, b1 = prepared["w1"], prepared["b1"]
    w2, b2 = prepared["w2"], prepared["b2"]
    w3, b3 = prepared["w3"], prepared["b3"]

    B, in_size = x.shape
    out_size = w3.shape[1]

    # Batch-aware tiling: bound pad waste, keep bf16 sublane packing (16),
    # and give v7x's two TensorCores >= 2 grid steps for large batches.
    n = max(1, pl.cdiv(B, block_b))
    if n < 2 and B >= 256:
        n = 2
    tb = _round_up(pl.cdiv(B, n), 16)
    b_p = n * tb

    if b_p != B:
        # Only the batch axis is padded (at most tb-1 <= 15 extra rows per
        # grid step by construction); padded rows are sliced away below.
        x = jnp.pad(x, ((0, b_p - B), (0, 0)))

    out = pl.pallas_call(
        actor_kernel,
        out_shape=jax.ShapeDtypeStruct((b_p, out_size), jnp.float32),
        grid_spec=pltpu.PrefetchScalarGridSpec(
            num_scalar_prefetch=0,
            grid=(n,),
            in_specs=[
                # Batch-tiled activation stream (natural feature width).
                pl.BlockSpec((tb, in_size), lambda i: (i, 0)),
                # Weights / biases: full-array blocks, VMEM-resident across
                # all grid steps.
                pl.BlockSpec(w1.shape, lambda i: (0, 0)),
                pl.BlockSpec(b1.shape, lambda i: (0, 0)),
                pl.BlockSpec(w2.shape, lambda i: (0, 0)),
                pl.BlockSpec(b2.shape, lambda i: (0, 0)),
                pl.BlockSpec(w3.shape, lambda i: (0, 0)),
                pl.BlockSpec(b3.shape, lambda i: (0, 0)),
            ],
            out_specs=pl.BlockSpec((tb, out_size), lambda i: (i, 0)),
        ),
        compiler_params=pltpu.CompilerParams(
            dimension_semantics=("parallel",)),
    )(x, w1, b1, w2, b2, w3, b3)

    return out[:B] if b_p != B else out


def init_actor_params(key, input_size, output_size):
    """Deterministic init mimicking nn.Linear's uniform(-1/sqrt(fan_in), ...).
    Weights stored already transposed to (in, out)."""
    dims = [(input_size, 128), (128, 64), (64, output_size)]
    params = {}
    for i, (fan_in, fan_out) in enumerate(dims, start=1):
        key, kw, kb = jax.random.split(key, 3)
        bound = 1.0 / jnp.sqrt(float(fan_in))
        params[f"w{i}"] = jax.random.uniform(
            kw, (fan_in, fan_out), jnp.float32, -bound, bound)
        params[f"b{i}"] = jax.random.uniform(
            kb, (1, fan_out), jnp.float32, -bound, bound)
    return params


def actor_reference(x, params, *, use_bf16=True):
    """Pure-JAX reference with the same operand dtype policy as the kernel."""
    cast = (lambda a: a.astype(jnp.bfloat16)) if use_bf16 else (lambda a: a)
    h1 = jnp.maximum(
        jnp.dot(cast(x), cast(params["w1"]),
                preferred_element_type=jnp.float32) + params["b1"], 0.0)
    h2 = jnp.maximum(
        jnp.dot(cast(h1), cast(params["w2"]),
                preferred_element_type=jnp.float32) + params["b2"], 0.0)
    return jnp.dot(cast(h2), cast(params["w3"]),
                   preferred_element_type=jnp.float32) + params["b3"]


if __name__ == "__main__":
    INPUT_SIZE = 16   # observation dim
    OUTPUT_SIZE = 8   # action dim
    BATCH = 8

    key = jax.random.PRNGKey(0)
    key, kx = jax.random.split(key)
    x = jax.random.normal(kx, (BATCH, INPUT_SIZE), jnp.float32)
    params = init_actor_params(key, INPUT_SIZE, OUTPUT_SIZE)

    # One-time params transform (cast/reshape) kept out of the per-step jit.
    prepared = prepare_actor_params(params, use_bf16=True)

    fwd = jax.jit(functools.partial(actor_forward, block_b=1024))
    out = jax.block_until_ready(fwd(x, prepared))

    ref_bf16 = actor_reference(x, params, use_bf16=True)
    ref_f32 = actor_reference(x, params, use_bf16=False)

    assert out.shape == (BATCH, OUTPUT_SIZE)
    # Exact-path check (same bf16 operand policy as the kernel).
    assert jnp.allclose(out, ref_bf16, atol=1e-4, rtol=1e-4), \
        "mismatch vs bf16-operand reference"
    # Sanity check vs. the full-f32 PyTorch-equivalent forward.
    assert jnp.allclose(out, ref_f32, atol=3e-2, rtol=3e-2), \
        "mismatch vs f32 reference"

    print("KERNEL_OK")
</pallas_src>

<mosaic_0001>
module attributes {stable_mosaic.version = 11 : i64} {
  func.func @actor_kernel(%arg0: i32, %arg1: memref<16x16xf32, #tpu.memory_space<vmem>>, %arg2: memref<16x128xbf16, #tpu.memory_space<vmem>>, %arg3: memref<1x128xf32, #tpu.memory_space<vmem>>, %arg4: memref<128x64xbf16, #tpu.memory_space<vmem>>, %arg5: memref<1x64xf32, #tpu.memory_space<vmem>>, %arg6: memref<64x8xbf16, #tpu.memory_space<vmem>>, %arg7: memref<1x8xf32, #tpu.memory_space<vmem>>, %arg8: memref<16x8xf32, #tpu.memory_space<vmem>>) attributes {dimension_semantics = [#tpu.dimension_semantics<parallel>], iteration_bounds = array<i64: 1>, scalar_prefetch = 0 : i64, scratch_operands = 0 : i64, tpu.core_type = #tpu.core_type<tc>, window_params = [{transform_indices = @transform_0, window_bounds = array<i64: 16, 16>}, {pipeline_mode = #tpu.pipeline_mode<synchronous>, transform_indices = @transform_1, window_bounds = array<i64: 16, 128>}, {pipeline_mode = #tpu.pipeline_mode<synchronous>, transform_indices = @transform_2, window_bounds = array<i64: 1, 128>}, {pipeline_mode = #tpu.pipeline_mode<synchronous>, transform_indices = @transform_3, window_bounds = array<i64: 128, 64>}, {pipeline_mode = #tpu.pipeline_mode<synchronous>, transform_indices = @transform_4, window_bounds = array<i64: 1, 64>}, {pipeline_mode = #tpu.pipeline_mode<synchronous>, transform_indices = @transform_5, window_bounds = array<i64: 64, 8>}, {pipeline_mode = #tpu.pipeline_mode<synchronous>, transform_indices = @transform_6, window_bounds = array<i64: 1, 8>}, {transform_indices = @transform_7, window_bounds = array<i64: 16, 8>}]} {
    %c0 = arith.constant 0 : index
    %c0_0 = arith.constant 0 : index
    %0 = vector.load %arg1[%c0, %c0_0] : memref<16x16xf32, #tpu.memory_space<vmem>>, vector<16x16xf32>
    %1 = arith.truncf %0 : vector<16x16xf32> to vector<16x16xbf16>
    %c0_1 = arith.constant 0 : index
    %c0_2 = arith.constant 0 : index
    %2 = vector.load %arg2[%c0_1, %c0_2] : memref<16x128xbf16, #tpu.memory_space<vmem>>, vector<16x128xbf16>
    %cst = arith.constant dense<0.000000e+00> : vector<16x128xf32>
    %3 = tpu.matmul %1, %2, %cst {dimension_numbers = #tpu.dot_dimension_numbers<[1], [0], [0], [1], [0, 0, 1, 1], [], []>} : vector<16x16xbf16>, vector<16x128xbf16>, vector<16x128xf32> -> vector<16x128xf32>
    %c0_3 = arith.constant 0 : index
    %c0_4 = arith.constant 0 : index
    %4 = vector.load %arg3[%c0_3, %c0_4] : memref<1x128xf32, #tpu.memory_space<vmem>>, vector<1x128xf32>
    %5 = vector.broadcast %4 : vector<1x128xf32> to vector<16x128xf32>
    %6 = arith.addf %3, %5 : vector<16x128xf32>
    %cst_5 = arith.constant 0.000000e+00 : f32
    %7 = vector.broadcast %cst_5 : f32 to vector<16x128xf32>
    %8 = arith.maximumf %6, %7 : vector<16x128xf32>
    %9 = arith.truncf %8 : vector<16x128xf32> to vector<16x128xbf16>
    %c0_6 = arith.constant 0 : index
    %c0_7 = arith.constant 0 : index
    %10 = vector.load %arg4[%c0_6, %c0_7] : memref<128x64xbf16, #tpu.memory_space<vmem>>, vector<128x64xbf16>
    %cst_8 = arith.constant dense<0.000000e+00> : vector<16x64xf32>
    %11 = tpu.matmul %9, %10, %cst_8 {dimension_numbers = #tpu.dot_dimension_numbers<[1], [0], [0], [1], [0, 0, 1, 1], [], []>} : vector<16x128xbf16>, vector<128x64xbf16>, vector<16x64xf32> -> vector<16x64xf32>
    %c0_9 = arith.constant 0 : index
    %c0_10 = arith.constant 0 : index
    %12 = vector.load %arg5[%c0_9, %c0_10] : memref<1x64xf32, #tpu.memory_space<vmem>>, vector<1x64xf32>
    %13 = vector.broadcast %12 : vector<1x64xf32> to vector<16x64xf32>
    %14 = arith.addf %11, %13 : vector<16x64xf32>
    %cst_11 = arith.constant 0.000000e+00 : f32
    %15 = vector.broadcast %cst_11 : f32 to vector<16x64xf32>
    %16 = arith.maximumf %14, %15 : vector<16x64xf32>
    %17 = arith.truncf %16 : vector<16x64xf32> to vector<16x64xbf16>
    %c0_12 = arith.constant 0 : index
    %c0_13 = arith.constant 0 : index
    %18 = vector.load %arg6[%c0_12, %c0_13] : memref<64x8xbf16, #tpu.memory_space<vmem>>, vector<64x8xbf16>
    %cst_14 = arith.constant dense<0.000000e+00> : vector<16x8xf32>
    %19 = tpu.matmul %17, %18, %cst_14 {dimension_numbers = #tpu.dot_dimension_numbers<[1], [0], [0], [1], [0, 0, 1, 1], [], []>} : vector<16x64xbf16>, vector<64x8xbf16>, vector<16x8xf32> -> vector<16x8xf32>
    %c0_15 = arith.constant 0 : index
    %c0_16 = arith.constant 0 : index
    %20 = vector.load %arg7[%c0_15, %c0_16] : memref<1x8xf32, #tpu.memory_space<vmem>>, vector<1x8xf32>
    %21 = vector.broadcast %20 : vector<1x8xf32> to vector<16x8xf32>
    %22 = arith.addf %19, %21 : vector<16x8xf32>
    %c0_17 = arith.constant 0 : index
    %c0_18 = arith.constant 0 : index
    %23 = vector.load %arg8[%c0_17, %c0_18] : memref<16x8xf32, #tpu.memory_space<vmem>>, vector<16x8xf32>
    tpu.vector_store %arg8[%c0_17, %c0_18], %22 {strides = array<i32>} : memref<16x8xf32, #tpu.memory_space<vmem>>, vector<16x8xf32>,
    return
  }
  func.func @transform_0(%arg0: i32) -> (i32, i32) {
    %c0_i32 = arith.constant 0 : i32
    %c0_i32_0 = arith.constant 0 : i32
    return %arg0, %c0_i32 : i32, i32
  }
  func.func @transform_1(%arg0: i32) -> (i32, i32) {
    %c0_i32 = arith.constant 0 : i32
    %c0_i32_0 = arith.constant 0 : i32
    %c0_i32_1 = arith.constant 0 : i32
    return %c0_i32, %c0_i32_0 : i32, i32
  }
  func.func @transform_2(%arg0: i32) -> (i32, i32) {
    %c0_i32 = arith.constant 0 : i32
    %c0_i32_0 = arith.constant 0 : i32
    %c0_i32_1 = arith.constant 0 : i32
    return %c0_i32, %c0_i32_0 : i32, i32
  }
  func.func @transform_3(%arg0: i32) -> (i32, i32) {
    %c0_i32 = arith.constant 0 : i32
    %c0_i32_0 = arith.constant 0 : i32
    %c0_i32_1 = arith.constant 0 : i32
    return %c0_i32, %c0_i32_0 : i32, i32
  }
  func.func @transform_4(%arg0: i32) -> (i32, i32) {
    %c0_i32 = arith.constant 0 : i32
    %c0_i32_0 = arith.constant 0 : i32
    %c0_i32_1 = arith.constant 0 : i32
    return %c0_i32, %c0_i32_0 : i32, i32
  }
  func.func @transform_5(%arg0: i32) -> (i32, i32) {
    %c0_i32 = arith.constant 0 : i32
    %c0_i32_0 = arith.constant 0 : i32
    %c0_i32_1 = arith.constant 0 : i32
    return %c0_i32, %c0_i32_0 : i32, i32
  }
  func.func @transform_6(%arg0: i32) -> (i32, i32) {
    %c0_i32 = arith.constant 0 : i32
    %c0_i32_0 = arith.constant 0 : i32
    %c0_i32_1 = arith.constant 0 : i32
    return %c0_i32, %c0_i32_0 : i32, i32
  }
  func.func @transform_7(%arg0: i32) -> (i32, i32) {
    %c0_i32 = arith.constant 0 : i32
    %c0_i32_0 = arith.constant 0 : i32
    return %arg0, %c0_i32 : i32, i32
  }
}

</mosaic_0001>

<bundles_post_ra>
// kernel: actor_forward.1
= control target key start
LH: loop header
LB: loop body
LE: loop exit
PB: predicated region body
PF: predicated region fallthrough
CT: control target
= control target key end

     0   :  { %v386_v0 = vmov 0.0   ;;  %vm387_vm0 = vmmov 0   ;;  %vm45_vm1 = vcmask 130048   ;;  %vm247_vm2 = vcmask 523264   ;;  %s491_s1 = inlined_call_operand.vmem [shape: bf16[16,128], index: 1, kind: input, shape index: {}]   ;;  %s492_s0 = inlined_call_operand.vmem [shape: f32[16,16], index: 0, kind: input, shape index: {}]   ;;  %s493_s3 = inlined_call_operand.vmem [shape: bf16[128,64], index: 3, kind: input, shape index: {}]   ;;  %s494_s5 = inlined_call_operand.vmem [shape: bf16[64,8], index: 5, kind: input, shape index: {}]   ;;  %s495_s2 = inlined_call_operand.vmem [shape: f32[1,128], index: 2, kind: input, shape index: {}]   ;;  %s496_s4 = inlined_call_operand.vmem [shape: f32[1,64], index: 4, kind: input, shape index: {}]   ;;  %s497_s6 = inlined_call_operand.vmem [shape: f32[1,8], index: 6, kind: input, shape index: {}]   ;;  %s498_s7 = inlined_call_operand.vmem [shape: f32[16,8], index: 7, kind: output, shape index: {}]  }
   0x1   :  { %333 = vmatprep.subr.bf16.mxu0 %v386_v0  ;;  %v373_v1 = vld [vmem:[%s491_s1] sm:$0xff]   ;;  %335 = vmatprep.mubr.msk.bf16.mxu0 %vm387_vm0, %v386_v0  ;;  %v28_v3 = vld [vmem:[%s492_s0 + $0x8] sm:$0xff]  ;;  %v374_v5 = vld [vmem:[%s493_s3 + $0x38] sm:$0xff]   ;;  %vm292_vm3 = vcmask 64512  }
   0x2   :  { %v27_v2 = vld [vmem:[%s492_s0] sm:$0xff]  ;;  %339 = vmatprep.subr.bf16.mxu1 %v386_v0  ;;  %355 = vmatprep.mubr.msk.bf16.mxu1 %vm387_vm0, %v386_v0  ;;  %v375_v6 = vld [vmem:[%s493_s3 + $0x30] sm:$0xff]   ;;  %v376_v7 = vld [vmem:[%s493_s3 + $0x28] sm:$0xff]  }
   0x3   :  { %334 = vmatpush3.bf16.msra.mxu0 %v373_v1  ;;  %v29_v4 = vpack.c.bf16 %v28_v3, %v27_v2  ;;  %340 = vmatpush3.bf16.msra.mxu1 %v374_v5  ;;  %v377_v8 = vld [vmem:[%s493_s3 + $0x20] sm:$0xff]   ;;  %v378_v9 = vld [vmem:[%s493_s3 + $0x18] sm:$0xff]   ;;  %v379_v10 = vld [vmem:[%s493_s3 + $0x10] sm:$0xff]  }
   0x4   :  { %359 = vmatprep.subr.bf16.mxu0 %v386_v0  ;;  %341 = vmatprep.subr.bf16.mxu1 %v386_v0  ;;  %v380_v11 = vld [vmem:[%s493_s3 + $0x8] sm:$0xff]   ;;  %v381_v12 = vld [vmem:[%s493_s3] sm:$0xff]   ;;  %v382_v13 = vld [vmem:[%s494_s5 + $0x18] sm:$0xff]  }
   0x5   :  { %v299_v14 = vld [vmem:[%s495_s2] ss:$0 sm:$0xff]  ;;  %v383_v24 = vld [vmem:[%s494_s5 + $0x10] sm:$0xff]   ;;  %v384_v25 = vld [vmem:[%s494_s5 + $0x8] sm:$0xff]  }
   0x6   :  { %336 = vmatmul.mubr.msk.bf16.vlgmr.msra.gmra.mxu0 %vm45_vm1, %v29_v4  ;;  %v385_v26 = vld [vmem:[%s494_s5] sm:$0xff]  }
   0x7   :  { %367 = vmatprep.mubr.msk.bf16.mxu0 %vm387_vm0, %v386_v0  ;;  %342 = vmatpush3.bf16.msra.mxu1 %v375_v6  ;;  %v302_v27 = vld [vmem:[%s496_s4] ss:$0 sm:$0xff] }
   0x8   :  { %343 = vmatprep.subr.bf16.mxu1 %v386_v0  ;;  %360 = vmatpush3.bf16.msra.mxu0 %v382_v13  ;;  %v311_v37 = vld [vmem:[%s497_s6] ss:$0 sm:$0xff] }
   0x9   :  { %361 = vmatprep.subr.bf16.mxu0 %v386_v0 }
   0xb   :  { %344 = vmatpush3.bf16.msra.mxu1 %v376_v7 }
   0xc   :  { %345 = vmatprep.subr.bf16.mxu1 %v386_v0  ;;  %362 = vmatpush3.bf16.msra.mxu0 %v383_v24 }
   0xd   :  { %363 = vmatprep.subr.bf16.mxu0 %v386_v0 }
   0xf   :  { %346 = vmatpush3.bf16.msra.mxu1 %v377_v8 }
  0x10   :  { %347 = vmatprep.subr.bf16.mxu1 %v386_v0  ;;  %364 = vmatpush3.bf16.msra.mxu0 %v384_v25 }
  0x11   :  { %365 = vmatprep.subr.bf16.mxu0 %v386_v0 }
  0x13   :  { %348 = vmatpush3.bf16.msra.mxu1 %v378_v9 }
  0x14   :  { %349 = vmatprep.subr.bf16.mxu1 %v386_v0  ;;  %366 = vmatpush3.bf16.msra.mxu0 %v385_v26 }
  0x17   :  { %350 = vmatpush3.bf16.msra.mxu1 %v379_v10 }
  0x18   :  { %351 = vmatprep.subr.bf16.mxu1 %v386_v0 }
  0x1b   :  { %352 = vmatpush3.bf16.msra.mxu1 %v380_v11 }
  0x1c   :  { %353 = vmatprep.subr.bf16.mxu1 %v386_v0 }
  0x1f   :  { %354 = vmatpush3.bf16.msra.mxu1 %v381_v12 }
  0xc6   :  { %v83_v15 = vpop.f32.mrf.mxu0 }
  0xc7   :  { %v84_v17 = vadd.f32 %v299_v14, %v83_v15 }
  0xc8   :  { %v337_v16 = vpop.f32.mrf.mxu0 }
  0xc9   :  { %v90_v21 = vmax.f32 %v84_v17, 0.0 }
  0xca   :  { %v86_v18 = vpop.f32.mrf.mxu0 }
  0xcb   :  { %v87_v19 = vadd.f32 %v299_v14, %v86_v18 }
  0xcc   :  { %v338_v20 = vpop.f32.mrf.mxu0 }
  0xcd   :  { %v91_v22 = vmax.f32 %v87_v19, 0.0 }
  0xcf   :  { %v92_v23 = vpack.c.bf16 %v91_v22, %v90_v21 }
  0xd1   :  { %356 = vmatmul.mubr.bf16.vlgmr.msra.gmra.mxu1 %v92_v23 }
 0x191   :  { %v198_v28 = vpop.f32.mrf.mxu1 }
 0x192   :  { %v199_v30 = vadd.f32 %v302_v27, %v198_v28 }
 0x193   :  { %v357_v29 = vpop.f32.mrf.mxu1 }
 0x194   :  { %v205_v34 = vmax.f32 %v199_v30, 0.0 }
 0x195   :  { %v201_v31 = vpop.f32.mrf.mxu1 }
 0x196   :  { %v202_v32 = vadd.f32 %v302_v27, %v201_v31 }
 0x197   :  { %v358_v33 = vpop.f32.mrf.mxu1 }
 0x198   :  { %v206_v35 = vmax.f32 %v202_v32, 0.0 }
 0x19a   :  { %v207_v36 = vpack.c.bf16 %v206_v35, %v205_v34 }
 0x19c   :  { %368 = vmatmul.mubr.msk.bf16.vlgmr.msra.gmra.mxu0 %vm247_vm2, %v207_v36 }
 0x25c   :  { %v285_v38 = vpop.f32.mrf.mxu0 }
 0x25d   :  { %v286_v39 = vadd.f32 %v311_v37, %v285_v38 }
 0x25e   :  { %v369_v40 = vpop.f32.mrf.mxu0 }
 0x25f   :  { %293 = vst.msk [vmem:[%s498_s7] sm:$0xff] %vm292_vm3, %v286_v39 }
 0x260   :  { %v288_v41 = vpop.f32.mrf.mxu0 }
 0x261   :  { %v289_v42 = vadd.f32 %v311_v37, %v288_v41 }
 0x262   :  { %v370_v43 = vpop.f32.mrf.mxu0 }
 0x263   :  { %294 = vst.msk [vmem:[%s498_s7 + $0x8] sm:$0xff] %vm292_vm3, %v289_v42 }

</bundles_post_ra>
